<compile_context>
chip_gen: v7x
topology: tpu7x:2x2x1
jax: 0.10.0
libtpu: 0.0.40
codegen_flags: <defaults>
</compile_context>

<pallas_src>
import functools

import jax
import jax.numpy as jnp
from jax.experimental import pallas as pl
from jax.experimental.pallas import tpu as pltpu

ACT_DTYPE = jnp.bfloat16      # storage dtype for weights / inter-layer activations


# ------------------------------ tiling helpers ------------------------------

def _round_up(x, m):
    return (x + m - 1) // m * m


def _pad2(a, rows, cols):
    r, c = a.shape
    if (r, c) == (rows, cols):
        return a
    return jnp.pad(a, ((0, rows - r), (0, cols - c)))


def _pick_m_tile(dim, max_tile=256):
    """Row (sublane) tile: multiple of 16 (bf16 packing), capped at max_tile."""
    dp = _round_up(dim, 16)
    if dp <= max_tile:
        return dp, dp
    return max_tile, _round_up(dp, max_tile)


def _pick_n_tile(dim):
    """Output-lane tile: multiple of 128, capped at 256."""
    dp = _round_up(dim, 128)
    if dp <= 256:
        return dp, dp
    for t in (256, 128):
        if dp % t == 0:
            return t, dp
    return 128, dp  # unreachable (dp is a multiple of 128)


def _pick_k_tile(dim):
    """Contraction tile: multiple of 128, capped at 512, prefer no padding."""
    dp = _round_up(dim, 128)
    if dp <= 512:
        return dp, dp
    for t in (512, 384, 256, 128):
        if dp % t == 0:
            return t, dp
    return 512, _round_up(dp, 512)  # unreachable


# ----------------------------- Pallas kernels ------------------------------

def _linear_kernel(x_ref, w_ref, b_ref, o_ref, acc_ref, *, activation):
    """One (tm, tn) output tile; K is the innermost ("arbitrary") grid axis."""
    @pl.when(pl.program_id(2) == 0)
    def _():
        acc_ref[...] = jnp.zeros_like(acc_ref)

    acc_ref[...] += jnp.dot(x_ref[...], w_ref[...],
                            preferred_element_type=jnp.float32)

    @pl.when(pl.program_id(2) == pl.num_programs(2) - 1)
    def _():
        y = acc_ref[...] + b_ref[...]
        if activation == "gelu":
            # exact (erf-based) GELU, matching torch F.gelu default
            y = 0.5 * y * (1.0 + jax.lax.erf(y * 0.7071067811865476))
        o_ref[...] = y.astype(o_ref.dtype)


def linear(x, w, b, *, activation=None, out_dtype=None):
    """y = act(x @ w + b); bf16 inputs, f32 MXU accumulation, M/N/K tiled."""
    M, K = x.shape
    K2, N = w.shape
    assert K == K2
    out_dtype = out_dtype if out_dtype is not None else x.dtype

    tm, Mp = _pick_m_tile(M, 256)
    tn, Np = _pick_n_tile(N)
    tk, Kp = _pick_k_tile(K)

    xp = _pad2(x, Mp, Kp)
    wp = _pad2(w, Kp, Np)
    bp = _pad2(b.astype(jnp.float32).reshape(1, N), 1, Np)

    out = pl.pallas_call(
        functools.partial(_linear_kernel, activation=activation),
        out_shape=jax.ShapeDtypeStruct((Mp, Np), out_dtype),
        grid=(Mp // tm, Np // tn, Kp // tk),
        in_specs=[
            pl.BlockSpec((tm, tk), lambda i, j, k: (i, k)),
            pl.BlockSpec((tk, tn), lambda i, j, k: (k, j)),
            pl.BlockSpec((1, tn), lambda i, j, k: (0, j)),
        ],
        out_specs=pl.BlockSpec((tm, tn), lambda i, j, k: (i, j)),
        scratch_shapes=[pltpu.VMEM((tm, tn), jnp.float32)],
        compiler_params=pltpu.CompilerParams(
            dimension_semantics=("parallel", "parallel", "arbitrary")),
    )(xp, wp, bp)
    return out[:M, :N]


def _ln_math(x32, g_ref, b_ref, o_ref):
    mean = jnp.mean(x32, axis=-1, keepdims=True)
    xc = x32 - mean
    var = jnp.mean(xc * xc, axis=-1, keepdims=True)       # biased var, like torch
    inv = jax.lax.rsqrt(var + 1e-5)
    y = xc * inv * g_ref[...] + b_ref[...]
    o_ref[...] = y.astype(o_ref.dtype)


def _layernorm_kernel(x_ref, g_ref, b_ref, o_ref):
    _ln_math(x_ref[...].astype(jnp.float32), g_ref, b_ref, o_ref)


def _layernorm_res_kernel(x_ref, r_ref, g_ref, b_ref, o_ref):
    x32 = x_ref[...].astype(jnp.float32) + r_ref[...].astype(jnp.float32)
    _ln_math(x32, g_ref, b_ref, o_ref)


def layernorm(x, gamma, beta, residual=None, *, out_dtype=None):
    """LayerNorm over the last axis; optional fused residual add; row tiled."""
    M, E = x.shape
    out_dtype = out_dtype if out_dtype is not None else x.dtype
    tr, Mp = _pick_m_tile(M, 512)

    xp = _pad2(x, Mp, E)
    g = gamma.astype(jnp.float32).reshape(1, E)
    b = beta.astype(jnp.float32).reshape(1, E)

    row_spec = pl.BlockSpec((tr, E), lambda i: (i, 0))
    vec_spec = pl.BlockSpec((1, E), lambda i: (0, 0))

    if residual is None:
        kernel, in_specs, args = _layernorm_kernel, [row_spec, vec_spec, vec_spec], (xp, g, b)
    else:
        rp = _pad2(residual, Mp, E)
        kernel = _layernorm_res_kernel
        in_specs = [row_spec, row_spec, vec_spec, vec_spec]
        args = (xp, rp, g, b)

    out = pl.pallas_call(
        kernel,
        out_shape=jax.ShapeDtypeStruct((Mp, E), out_dtype),
        grid=(Mp // tr,),
        in_specs=in_specs,
        out_specs=row_spec,
        compiler_params=pltpu.CompilerParams(dimension_semantics=("parallel",)),
    )(*args)
    return out[:M]


def _attention_kernel(q_ref, k_ref, v_ref, o_ref, *, scale):
    # softmax statistics in f32; probabilities cast back to bf16 for the MXU.
    q = q_ref[...].astype(jnp.float32) * scale
    k = k_ref[...].astype(jnp.float32)
    s = jnp.einsum("gld,gmd->glm", q, k, preferred_element_type=jnp.float32)
    s = s - jnp.max(s, axis=-1, keepdims=True)
    p = jnp.exp(s)
    denom = jnp.sum(p, axis=-1, keepdims=True)
    p = (p * pl.reciprocal(denom, approx=True)).astype(v_ref.dtype)
    o = jnp.einsum("glm,gmd->gld", p, v_ref[...],
                   preferred_element_type=jnp.float32)
    o_ref[...] = o.astype(o_ref.dtype)


def attention(q, k, v, scale):
    """Softmax attention per head-group, tiled over the group axis."""
    G, L, d = q.shape
    dp = _round_up(d, 128)                    # lane-pad the tiny head dim
    tg = min(16, _round_up(G, 8))
    Gp = _round_up(G, tg)

    def pad3(a):
        return jnp.pad(a, ((0, Gp - G), (0, 0), (0, dp - d)))

    spec = pl.BlockSpec((tg, L, dp), lambda g: (g, 0, 0))
    out = pl.pallas_call(
        functools.partial(_attention_kernel, scale=scale),
        out_shape=jax.ShapeDtypeStruct((Gp, L, dp), q.dtype),
        grid=(Gp // tg,),
        in_specs=[spec, spec, spec],
        out_specs=spec,
        compiler_params=pltpu.CompilerParams(dimension_semantics=("parallel",)),
    )(pad3(q), pad3(k), pad3(v))
    return out[:G, :, :d]


# ------------------------------ parameters ---------------------------------

def init_params(key, *, num_channels, patch_size, embedding_dim, mlp_size,
                num_layers, num_classes, num_patches):
    E, P = embedding_dim, patch_size

    def nrm(k, shape, scale=0.02):
        return (scale * jax.random.normal(k, shape, dtype=jnp.float32)).astype(ACT_DTYPE)

    keys = iter(jax.random.split(key, 8 + 8 * num_layers))
    params = {
        # Conv2d(k=s=P) expressed as a per-patch linear: (C*P*P, E)
        "patch_w": nrm(next(keys), (num_channels * P * P, E)),
        "patch_b": jnp.zeros((E,), jnp.float32),
        "class_token": jax.random.normal(next(keys), (1, 1, E), dtype=jnp.float32),
        "pos_embedding": jax.random.normal(next(keys), (1, num_patches + 1, E),
                                           dtype=jnp.float32),
        "norm_g": jnp.ones((E,), jnp.float32),
        "norm_b": jnp.zeros((E,), jnp.float32),
        "head_ln_g": jnp.ones((E,), jnp.float32),
        "head_ln_b": jnp.zeros((E,), jnp.float32),
        "head_w": nrm(next(keys), (E, num_classes)),
        "head_b": jnp.zeros((num_classes,), jnp.float32),
        "layers": [],
    }
    for _ in range(num_layers):
        params["layers"].append({
            "w_qkv": nrm(next(keys), (E, 3 * E)),
            "b_qkv": jnp.zeros((3 * E,), jnp.float32),
            "w_out": nrm(next(keys), (E, E)),
            "b_out": jnp.zeros((E,), jnp.float32),
            "w1": nrm(next(keys), (E, mlp_size)),
            "b1": jnp.zeros((mlp_size,), jnp.float32),
            "w2": nrm(next(keys), (mlp_size, E)),
            "b2": jnp.zeros((E,), jnp.float32),
            "ln1_g": jnp.ones((E,), jnp.float32),
            "ln1_b": jnp.zeros((E,), jnp.float32),
            "ln2_g": jnp.ones((E,), jnp.float32),
            "ln2_b": jnp.zeros((E,), jnp.float32),
        })
    return params


# ------------------------------- forward -----------------------------------

def vit_forward(params, x, *, patch_size, num_heads):
    B, C, H, W = x.shape
    P = patch_size
    assert H % P == 0 and W % P == 0
    Hp, Wp = H // P, W // P
    N = Hp * Wp
    E = params["patch_w"].shape[1]

    # --- PatchEmbedding: Conv2d(k=s=P) == per-patch linear projection ---
    patches = (x.reshape(B, C, Hp, P, Wp, P)
                 .transpose(0, 2, 4, 1, 3, 5)          # B, Hp, Wp, C, P, P
                 .reshape(B * N, C * P * P)).astype(ACT_DTYPE)
    emb = linear(patches, params["patch_w"], params["patch_b"],
                 out_dtype=ACT_DTYPE).reshape(B, N, E)

    # --- class token + positional embedding (tiny wrapper glue) ---
    cls = jnp.broadcast_to(params["class_token"], (B, 1, E))
    tokens = jnp.concatenate([cls, emb.astype(jnp.float32)], axis=1)  # (B, S, E)
    tokens = (tokens + params["pos_embedding"]).astype(ACT_DTYPE)
    # TODO(synk): all Dropout layers are identity here (eval-mode semantics).

    S = N + 1
    flat = layernorm(tokens.reshape(B * S, E), params["norm_g"], params["norm_b"],
                     out_dtype=ACT_DTYPE)
    x_seq = flat.reshape(B, S, E)

    # --- TransformerEncoder (post-norm layers, attention over axis 0 = B) ---
    L, Nn, Hh = B, S, num_heads
    d = E // Hh
    scale = 1.0 / (d ** 0.5)

    # TODO(synk): head split/merge transposes remain XLA glue; they could be
    # folded into the kernels with pltpu.einshape-style in-kernel reshapes.
    def to_heads(t):   # (L*Nn, E) -> (Nn*Hh, L, d)   (PyTorch MHA ordering)
        return t.reshape(L, Nn, Hh, d).transpose(1, 2, 0, 3).reshape(Nn * Hh, L, d)

    for layer in params["layers"]:
        flat = x_seq.reshape(L * Nn, E)
        qkv = linear(flat, layer["w_qkv"], layer["b_qkv"], out_dtype=ACT_DTYPE)
        q, k, v = jnp.split(qkv, 3, axis=-1)
        o = attention(to_heads(q), to_heads(k), to_heads(v), scale)
        o = (o.reshape(Nn, Hh, L, d).transpose(2, 0, 1, 3).reshape(L * Nn, E))
        attn_out = linear(o, layer["w_out"], layer["b_out"], out_dtype=ACT_DTYPE)
        x1 = layernorm(attn_out, layer["ln1_g"], layer["ln1_b"],
                       residual=flat, out_dtype=ACT_DTYPE)
        ff = linear(x1, layer["w1"], layer["b1"], activation="gelu",
                    out_dtype=ACT_DTYPE)
        ff = linear(ff, layer["w2"], layer["b2"], out_dtype=ACT_DTYPE)
        x2 = layernorm(ff, layer["ln2_g"], layer["ln2_b"],
                       residual=x1, out_dtype=ACT_DTYPE)
        x_seq = x2.reshape(L, Nn, E)

    # --- MLP head on the class-token column: x[:, 0] -> (B, E) ---
    cls_out = x_seq[:, 0, :]
    h = layernorm(cls_out, params["head_ln_g"], params["head_ln_b"],
                  out_dtype=ACT_DTYPE)
    logits = linear(h, params["head_w"], params["head_b"], out_dtype=jnp.float32)
    return logits


# --------------------------------- main -------------------------------------

if __name__ == "__main__":
    # small, consistent config: img 16x16, patch 8 -> 4 patches, seq 5
    B, C, IMG, P = 2, 3, 16, 8
    E, HEADS, MLP, LAYERS, CLASSES = 32, 4, 64, 2, 10

    key = jax.random.PRNGKey(0)
    pkey, xkey = jax.random.split(key)
    num_patches = (IMG // P) ** 2

    params = init_params(pkey, num_channels=C, patch_size=P, embedding_dim=E,
                         mlp_size=MLP, num_layers=LAYERS,
                         num_classes=CLASSES, num_patches=num_patches)
    x = jax.random.normal(xkey, (B, C, IMG, IMG), dtype=jnp.float32)

    out = vit_forward(params, x, patch_size=P, num_heads=HEADS)
    out = jax.block_until_ready(out)
    assert out.shape == (B, CLASSES), out.shape
    print("KERNEL_OK")
</pallas_src>

<mosaic_0001>
module attributes {stable_mosaic.version = 11 : i64} {
  func.func @_linear_kernel(%arg0: i32, %arg1: i32, %arg2: i32, %arg3: memref<16x256xbf16, #tpu.memory_space<vmem>>, %arg4: memref<256x128xbf16, #tpu.memory_space<vmem>>, %arg5: memref<1x128xf32, #tpu.memory_space<vmem>>, %arg6: memref<16x128xbf16, #tpu.memory_space<vmem>>, %arg7: memref<16x128xf32, #tpu.memory_space<vmem>>) attributes {dimension_semantics = [#tpu.dimension_semantics<parallel>, #tpu.dimension_semantics<parallel>, #tpu.dimension_semantics<arbitrary>], iteration_bounds = array<i64: 1, 1, 1>, scalar_prefetch = 0 : i64, scratch_operands = 1 : i64, tpu.core_type = #tpu.core_type<tc>, window_params = [{transform_indices = @transform_0, window_bounds = array<i64: 16, 256>}, {transform_indices = @transform_1, window_bounds = array<i64: 256, 128>}, {transform_indices = @transform_2, window_bounds = array<i64: 1, 128>}, {transform_indices = @transform_3, window_bounds = array<i64: 16, 128>}]} {
    %c0_i32 = arith.constant 0 : i32
    %0 = arith.cmpi eq, %arg2, %c0_i32 : i32
    %1 = arith.extui %0 : i1 to i32
    %c0_i32_0 = arith.constant 0 : i32
    %2 = arith.cmpi ne, %1, %c0_i32_0 : i32
    scf.if %2 {
      %cst_10 = arith.constant 0.000000e+00 : f32
      %12 = vector.broadcast %cst_10 : f32 to vector<16x128xf32>
      %c0_11 = arith.constant 0 : index
      %c0_12 = arith.constant 0 : index
      %13 = vector.load %arg7[%c0_11, %c0_12] : memref<16x128xf32, #tpu.memory_space<vmem>>, vector<16x128xf32>
      tpu.vector_store %arg7[%c0_11, %c0_12], %12 {strides = array<i32>} : memref<16x128xf32, #tpu.memory_space<vmem>>, vector<16x128xf32>,
    } else {
    }
    %c0 = arith.constant 0 : index
    %c0_1 = arith.constant 0 : index
    %3 = vector.load %arg7[%c0, %c0_1] : memref<16x128xf32, #tpu.memory_space<vmem>>, vector<16x128xf32>
    %c0_2 = arith.constant 0 : index
    %c0_3 = arith.constant 0 : index
    %4 = vector.load %arg3[%c0_2, %c0_3] : memref<16x256xbf16, #tpu.memory_space<vmem>>, vector<16x256xbf16>
    %c0_4 = arith.constant 0 : index
    %c0_5 = arith.constant 0 : index
    %5 = vector.load %arg4[%c0_4, %c0_5] : memref<256x128xbf16, #tpu.memory_space<vmem>>, vector<256x128xbf16>
    %cst = arith.constant dense<0.000000e+00> : vector<16x128xf32>
    %6 = tpu.matmul %4, %5, %cst {dimension_numbers = #tpu.dot_dimension_numbers<[1], [0], [0], [1], [0, 0, 1, 1], [], []>} : vector<16x256xbf16>, vector<256x128xbf16>, vector<16x128xf32> -> vector<16x128xf32>
    %7 = arith.addf %3, %6 : vector<16x128xf32>
    %c0_6 = arith.constant 0 : index
    %c0_7 = arith.constant 0 : index
    %8 = vector.load %arg7[%c0_6, %c0_7] : memref<16x128xf32, #tpu.memory_space<vmem>>, vector<16x128xf32>
    tpu.vector_store %arg7[%c0_6, %c0_7], %7 {strides = array<i32>} : memref<16x128xf32, #tpu.memory_space<vmem>>, vector<16x128xf32>,
    %c0_i32_8 = arith.constant 0 : i32
    %9 = arith.cmpi eq, %arg2, %c0_i32_8 : i32
    %10 = arith.extui %9 : i1 to i32
    %c0_i32_9 = arith.constant 0 : i32
    %11 = arith.cmpi ne, %10, %c0_i32_9 : i32
    scf.if %11 {
      %c0_10 = arith.constant 0 : index
      %c0_11 = arith.constant 0 : index
      %12 = vector.load %arg7[%c0_10, %c0_11] : memref<16x128xf32, #tpu.memory_space<vmem>>, vector<16x128xf32>
      %c0_12 = arith.constant 0 : index
      %c0_13 = arith.constant 0 : index
      %13 = vector.load %arg5[%c0_12, %c0_13] : memref<1x128xf32, #tpu.memory_space<vmem>>, vector<1x128xf32>
      %14 = vector.broadcast %13 : vector<1x128xf32> to vector<16x128xf32>
      %15 = arith.addf %12, %14 : vector<16x128xf32>
      %16 = arith.truncf %15 : vector<16x128xf32> to vector<16x128xbf16>
      %c0_14 = arith.constant 0 : index
      %c0_15 = arith.constant 0 : index
      %17 = vector.load %arg6[%c0_14, %c0_15] : memref<16x128xbf16, #tpu.memory_space<vmem>>, vector<16x128xbf16>
      tpu.vector_store %arg6[%c0_14, %c0_15], %16 {strides = array<i32>} : memref<16x128xbf16, #tpu.memory_space<vmem>>, vector<16x128xbf16>,
    } else {
    }
    return
  }
  func.func @transform_0(%arg0: i32, %arg1: i32, %arg2: i32) -> (i32, i32) {
    %c0_i32 = arith.constant 0 : i32
    return %arg0, %arg2 : i32, i32
  }
  func.func @transform_1(%arg0: i32, %arg1: i32, %arg2: i32) -> (i32, i32) {
    %c0_i32 = arith.constant 0 : i32
    return %arg2, %arg1 : i32, i32
  }
  func.func @transform_2(%arg0: i32, %arg1: i32, %arg2: i32) -> (i32, i32) {
    %c0_i32 = arith.constant 0 : i32
    %c0_i32_0 = arith.constant 0 : i32
    return %c0_i32, %arg1 : i32, i32
  }
  func.func @transform_3(%arg0: i32, %arg1: i32, %arg2: i32) -> (i32, i32) {
    %c0_i32 = arith.constant 0 : i32
    return %arg0, %arg1 : i32, i32
  }
}

</mosaic_0001>

<bundles_post_ra>
// kernel: tpu_custom_call.1
= control target key start
LH: loop header
LB: loop body
LE: loop exit
PB: predicated region body
PF: predicated region fallthrough
CT: control target
= control target key end

     0   :  { %8 = vsyncpa [#allocation4], 0  ;;  %s499_s0 = inlined_call_operand.hbm [shape: bf16[16,256], index: 0, kind: input, shape index: {}]   ;;  %s500_s1 = inlined_call_operand.hbm [shape: bf16[256,128], index: 1, kind: input, shape index: {}]   ;;  %s501_s2 = inlined_call_operand.vmem [shape: f32[1,128], index: 2, kind: input, shape index: {}]   ;;  %s502_s3 = inlined_call_operand.hbm [shape: bf16[16,128], index: 3, kind: output, shape index: {}]  }
   0x1   :  { %9 = vsyncpa [#allocation7], 0 }
   0x2   :  { %10 = vsyncpa [#allocation5], 0  ;;  %s427_s12 = smov [#allocation3]   ;;  %s355_s16 = scalar_lea.hbm %s499_s0, 256 }
   0x3   :  { %s16_s13 = sshll.u32 %s427_s12, 4  ;;  %p356_p0 = scmp.ne.s32.totalorder %s499_s0, %s355_s16  ;;  %s17_s13 = int_to_ptr.vmem [resolvable:$true] %s16_s13 }
   0x4   :  { %p359_p1 = scmp.lt.u32.totalorder %s355_s16, %s499_s0 }
   0x6   :  { %p361_p2 = pnand %p359_p1, %p356_p0 }
   0x8   :  { %364 = shalt.err (!%p361_p2)
}
   0x9   :  { %s365_s21 = scalar_lea.vmem %s17_s13, 256  ;;  %p370_p4 = scmp.lt.s32.totalorder %s17_s13, %s17_s13 }
   0xa   :  { %p366_p3 = scmp.ne.s32.totalorder %s17_s13, %s365_s21  ;;  %p371_p5 = scmp.lt.s32.totalorder %s365_s21, %s365_s21 }
   0xc   :  { %p372_p6 = por %p371_p5, %p370_p4 }
   0xe   :  { %p373_p7 = pnand %p372_p6, %p366_p3 }
  0x10   :  { %376 = shalt.err (!%p373_p7)
}
  0x11   :  { %s428_s22 = smov 128   ;;  %s429_s23 = smov 8  }
  0x12   :  { %22 = dma.hbm_to_vmem [thread:$0]  %s499_s0, 256, %s17_s13, [#allocation4], %s428_s22, %s428_s22, %s429_s23  }
  0x13   :  { %s430_s26 = smov [#allocation6]   ;;  %s377_s30 = scalar_lea.hbm %s500_s1, 2048 }
  0x14   :  { %s28_s27 = sshll.u32 %s430_s26, 4  ;;  %p378_p8 = scmp.ne.s32.totalorder %s500_s1, %s377_s30  ;;  %s29_s27 = int_to_ptr.vmem [resolvable:$true] %s28_s27 }
  0x15   :  { %p381_p9 = scmp.lt.u32.totalorder %s377_s30, %s500_s1 }
  0x17   :  { %p383_p10 = pnand %p381_p9, %p378_p8 }
  0x19   :  { %386 = shalt.err (!%p383_p10)
}
  0x1a   :  { %s387_s8 = scalar_lea.vmem %s29_s27, 2048  ;;  %p392_p12 = scmp.lt.s32.totalorder %s29_s27, %s29_s27 }
  0x1b   :  { %p388_p11 = scmp.ne.s32.totalorder %s29_s27, %s387_s8  ;;  %p393_p13 = scmp.lt.s32.totalorder %s387_s8, %s387_s8 }
  0x1d   :  { %p394_p0 = por %p393_p13, %p392_p12 }
  0x1f   :  { %p395_p1 = pnand %p394_p0, %p388_p11 }
  0x21   :  { %398 = shalt.err (!%p395_p1)
}
  0x22   :  { %s431_s0 = smov 64   ;;  %s432_s9 = smov 4  }
  0x23   :  { %34 = dma.hbm_to_vmem [thread:$0]  %s500_s1, 2048, %s29_s27, [#allocation7], %s431_s0, %s431_s0, %s432_s9  }
  0x24   :  { %421 = dma.done.wait [#allocation4], 256  }
  0x25   :  { %422 = vsyncadd [#allocation4], 4294967040 }
  0x26   :  { %423 = dma.done.wait [#allocation7], 2048  }
  0x27   :  { %424 = vsyncadd [#allocation7], 4294965248  ;;  %v336_v0 = vld [vmem:[#allocation6 + $0x40] sm:$0xff]   ;;  %v338_v2 = vld [vmem:[#allocation6 + $0x48] sm:$0xff]   ;;  %s433_s13 = smov [#allocation8]  }
  0x28   :  { %v337_v1 = vld [vmem:[#allocation6] sm:$0xff]   ;;  %307 = vmatprep.subr.bf16.mxu0 %v336_v0  ;;  %v339_v3 = vld [vmem:[#allocation6 + $0x8] sm:$0xff]   ;;  %v340_v4 = vld [vmem:[#allocation6 + $0x50] sm:$0xff]   ;;  %s266_s14 = sshll.u32 %s433_s13, 4  ;;  %s267_s14 = int_to_ptr.vmem [resolvable:$true] %s266_s14 }
  0x29   :  { %308 = vmatpush3.bf16.msra.mxu0 %v337_v1  ;;  %v341_v5 = vld [vmem:[#allocation6 + $0x10] sm:$0xff]   ;;  %v342_v6 = vld [vmem:[#allocation6 + $0x58] sm:$0xff]   ;;  %v344_v8 = vld [vmem:[#allocation6 + $0x60] sm:$0xff]   ;;  %s399_s15 = scalar_lea.vmem %s267_s14, 128  ;;  %p404_p3 = scmp.lt.s32.totalorder %s267_s14, %s267_s14 }
  0x2a   :  { %309 = vmatprep.subr.bf16.mxu0 %v338_v2  ;;  %v343_v7 = vld [vmem:[#allocation6 + $0x18] sm:$0xff]   ;;  %v345_v9 = vld [vmem:[#allocation6 + $0x20] sm:$0xff]   ;;  %v346_v10 = vld [vmem:[#allocation6 + $0x68] sm:$0xff]   ;;  %p400_p2 = scmp.ne.s32.totalorder %s267_s14, %s399_s15  ;;  %p405_p4 = scmp.lt.s32.totalorder %s399_s15, %s399_s15 }
  0x2b   :  { %v354_v11 = vld [vmem:[#allocation3 + $0x4] ss:$8 sps:$4 sm:$0xff]   ;;  %v347_v12 = vld [vmem:[#allocation6 + $0x28] sm:$0xff]   ;;  %v352_v17 = vld [vmem:[#allocation3] ss:$8 sps:$4 sm:$0xff]  }
  0x2c   :  { %224 = vmatprep.mubr.bf16.mxu0 %v354_v11  ;;  %v348_v13 = vld [vmem:[#allocation6 + $0x70] sm:$0xff]   ;;  %v350_v15 = vld [vmem:[#allocation6 + $0x78] sm:$0xff]   ;;  %p406_p5 = por %p405_p4, %p404_p3 }
  0x2d   :  { %310 = vmatpush3.bf16.msra.mxu0 %v339_v3  ;;  %v349_v14 = vld [vmem:[#allocation6 + $0x30] sm:$0xff]   ;;  %v351_v16 = vld [vmem:[#allocation6 + $0x38] sm:$0xff]  }
  0x2e   :  { %311 = vmatprep.subr.bf16.mxu0 %v340_v4  ;;  %v297_v22 = vld [vmem:[%s501_s2] ss:$0 sm:$0xff]  ;;  %p407_p6 = pnand %p406_p5, %p400_p2 }
  0x31   :  { %312 = vmatpush3.bf16.msra.mxu0 %v341_v5 }
  0x32   :  { %313 = vmatprep.subr.bf16.mxu0 %v342_v6 }
  0x35   :  { %314 = vmatpush3.bf16.msra.mxu0 %v343_v7 }
  0x36   :  { %315 = vmatprep.subr.bf16.mxu0 %v344_v8 }
  0x39   :  { %316 = vmatpush3.bf16.msra.mxu0 %v345_v9 }
  0x3a   :  { %317 = vmatprep.subr.bf16.mxu0 %v346_v10 }
  0x3d   :  { %318 = vmatpush3.bf16.msra.mxu0 %v347_v12 }
  0x3e   :  { %319 = vmatprep.subr.bf16.mxu0 %v348_v13 }
  0x41   :  { %320 = vmatpush3.bf16.msra.mxu0 %v349_v14 }
  0x42   :  { %321 = vmatprep.subr.bf16.mxu0 %v350_v15 }
  0x45   :  { %322 = vmatpush3.bf16.msra.mxu0 %v351_v16 }
  0x48   :  { %225 = vmatmul.mubr.bf16.vlgmr.msra.gmra.mrb[0].mxu0 %v352_v17 }
 0x11b   :  { %v323_v18 = vpop.f32.mrb[0].mxu0 }
 0x11c   :  { %v324_v19 = vpop.f32.mrb[1].mxu0 }
 0x11d   :  { %v325_v20 = vadd.f32 %v324_v19, %v323_v18  ;;  %v326_v21 = vpop.f32.mrb[2].mxu0 }
 0x11e   :  { %v327_v23 = vpop.f32.mrb[3].mxu0 }
 0x11f   :  { %v328_v24 = vadd.f32 %v327_v23, %v326_v21  ;;  %v249_v25 = vadd.f32 %v325_v20, %v297_v22 }
 0x121   :  { %v250_v26 = vadd.f32 %v328_v24, %v297_v22 }
 0x123   :  { %v305_v27 = vpack.c.bf16 %v250_v26, %v249_v25 }
 0x125   :  { %306 = vst [vmem:[#allocation8] sm:$0xff] %v305_v27  }
 0x126   :  { %410 = shalt.err (!%p407_p6)
}
 0x127   :  { %s411_s2 = scalar_lea.hbm %s502_s3, 128 }
 0x128   :  { %p412_p7 = scmp.ne.s32.totalorder %s502_s3, %s411_s2  ;;  %p415_p8 = scmp.lt.u32.totalorder %s411_s2, %s502_s3 }
 0x12a   :  { %p417_p9 = pnand %p415_p8, %p412_p7 }
 0x12c   :  { %420 = shalt.err (!%p417_p9)
}
 0x12d   :  { %272 = dma.vmem_to_hbm [thread:$0]  %s267_s14, 128, %s502_s3, [#allocation5], %s431_s0, %s431_s0, %s432_s9  }
 0x12e   :  { %425 = dma.done.wait [#allocation5], 128  }
 0x12f   :  { %426 = vsyncadd [#allocation5], 4294967168 }
 0x130   :  { %276 = vsyncpa [#allocation4], 1 }
 0x131   :  { %277 = vsyncpa [#allocation7], 1 }
 0x132   :  { %278 = vsyncpa [#allocation5], 1 }

</bundles_post_ra>
